<compile_context>
chip_gen: v5e
topology: v5e:2x2
jax: 0.10.0
libtpu: 0.0.40
codegen_flags: <defaults>
</compile_context>

<pallas_src>
import functools

import jax
import jax.numpy as jnp
from jax.experimental import pallas as pl
from jax.experimental.pallas import tpu as pltpu

NEG_SLOPE = 0.01   # torch leaky_relu default
NUM_LAYERS = 10    # lin_1 + 4 * (lin_1, lin_2) + lin_last


def _leaky_relu(v):
    return jnp.where(v > 0, v, NEG_SLOPE * v)


def res_forward_kernel(phi_ref, act_ref, wt_ref, b_ref, out_ref, xa_ref):
    """Pushes one [n_tile, F] tile of rows through all 10 layers.

    phi_ref: [nt, F]    act_ref: [nt, A]
    wt_ref:  [10, F+A, F]  (transposed torch weights: wt[i] = W_i.T)
    b_ref:   [10, 1, F]
    out_ref: [nt, F]
    xa_ref:  f32 VMEM scratch [nt, F+A] holding the fused [x | action] operand.
    """
    f = phi_ref.shape[-1]

    # Action half of the fused operand: written once per tile.
    xa_ref[:, f:] = act_ref[...].astype(jnp.float32)

    def lin(i, x):
        # Refresh the feature half, then one K = F+A, weights-stationary dot.
        xa_ref[:, :f] = x
        return (
            jnp.dot(xa_ref[...], wt_ref[i], preferred_element_type=jnp.float32)
            + b_ref[i]
        )

    # lin_1
    x = _leaky_relu(lin(0, phi_ref[...].astype(jnp.float32)))

    # 4 residual blocks (layers 1..8)
    for k in range(4):
        res = _leaky_relu(lin(1 + 2 * k, x))
        res = lin(2 + 2 * k, res)
        x = res + x

    # lin_last
    out_ref[...] = lin(9, x).astype(out_ref.dtype)


@functools.partial(jax.jit, static_argnames=("n_tile",))
def res_forward(phi1, action, w, b, *, n_tile=2048):
    """phi1: [T,B,F], action: [T,B,A], w: [10,F,F+A], b: [10,F] -> [T,B,F]."""
    assert n_tile % 8 == 0, "n_tile must be a multiple of the sublane width (8)"
    T, B, F = phi1.shape
    A = action.shape[-1]
    N = T * B

    # Row-major views: no transpose, no pad, no extra HBM passes.
    phi2 = phi1.reshape(N, F)
    act2 = action.reshape(N, A)
    wt = jnp.swapaxes(w, 1, 2)      # [10, F+A, F] (tiny; resident in VMEM)
    b2 = b[:, None, :]              # [10, 1, F]

    n_rows = -(-N // 8) * 8         # N rounded up to the sublane width
    nt = min(n_tile, n_rows)
    # Keep >= 2 grid steps when there is enough work so v7x's two TensorCores
    # both get a shard of the "parallel" axis.
    if pl.cdiv(N, nt) == 1 and n_rows >= 1024:
        nt = -(-(n_rows // 2) // 8) * 8
    grid = (pl.cdiv(N, nt),)

    flops = 2 * N * (F + A) * F * NUM_LAYERS
    bytes_accessed = 4 * (N * (2 * F + A) + NUM_LAYERS * (F * (F + A) + F))

    out2 = pl.pallas_call(
        res_forward_kernel,
        out_shape=jax.ShapeDtypeStruct((N, F), phi1.dtype),
        grid_spec=pltpu.PrefetchScalarGridSpec(
            num_scalar_prefetch=0,
            grid=grid,
            in_specs=[
                pl.BlockSpec((nt, F), lambda i: (i, 0)),
                pl.BlockSpec((nt, A), lambda i: (i, 0)),
                # Grid-invariant weights / biases: fetched once, stay resident.
                pl.BlockSpec((NUM_LAYERS, F + A, F), lambda i: (0, 0, 0)),
                pl.BlockSpec((NUM_LAYERS, 1, F), lambda i: (0, 0, 0)),
            ],
            out_specs=pl.BlockSpec((nt, F), lambda i: (i, 0)),
            scratch_shapes=[pltpu.VMEM((nt, F + A), jnp.float32)],
        ),
        compiler_params=pltpu.CompilerParams(
            dimension_semantics=("parallel",),
            vmem_limit_bytes=32 * 1024 * 1024,
        ),
        cost_estimate=pl.CostEstimate(
            flops=flops, transcendentals=0, bytes_accessed=bytes_accessed
        ),
    )(phi2, act2, wt, b2)

    return out2.reshape(T, B, F)


def init_params(key, feature_size, action_size):
    """PyTorch-style U(-1/sqrt(fan_in), 1/sqrt(fan_in)) init of the 10 Linears.

    w[i]: [F, F+A]  (torch nn.Linear layout: out = cat([x, a], -1) @ w[i].T + b[i])
    b[i]: [F]
    """
    F, A = feature_size, action_size
    bound = 1.0 / jnp.sqrt(jnp.float32(F + A))
    kw, kb = jax.random.split(key, 2)
    w = jax.random.uniform(kw, (NUM_LAYERS, F, F + A), jnp.float32, -bound, bound)
    b = jax.random.uniform(kb, (NUM_LAYERS, F), jnp.float32, -bound, bound)
    return w, b


def res_forward_ref(phi1, action, w, b):
    """Pure-JAX reference mirroring the PyTorch module."""
    def lin(i, x):
        return jnp.concatenate([x, action], axis=-1) @ w[i].T + b[i]

    x = _leaky_relu(lin(0, phi1))
    for k in range(4):
        res = _leaky_relu(lin(1 + 2 * k, x))
        res = lin(2 + 2 * k, res)
        x = res + x
    return lin(9, x)


if __name__ == "__main__":
    feature_size, action_size = 32, 16
    key = jax.random.PRNGKey(0)
    k_phi, k_act, k_param = jax.random.split(key, 3)
    w, b = init_params(k_param, feature_size, action_size)

    # Case 1: small problem, single block with the default tile.
    T, B = 4, 2
    phi1 = jax.random.normal(k_phi, (T, B, feature_size), jnp.float32)
    action = jax.random.normal(k_act, (T, B, action_size), jnp.float32)
    out = jax.block_until_ready(res_forward(phi1, action, w, b))
    ref = res_forward_ref(phi1, action, w, b)
    assert out.shape == (T, B, feature_size)
    assert jnp.allclose(out, ref, atol=1e-3, rtol=1e-3)

    # Case 2: multi-block grid with a ragged last block (N=35, n_tile=16).
    T2, B2 = 7, 5
    phi1b = jax.random.normal(k_phi, (T2, B2, feature_size), jnp.float32)
    actionb = jax.random.normal(k_act, (T2, B2, action_size), jnp.float32)
    outb = jax.block_until_ready(res_forward(phi1b, actionb, w, b, n_tile=16))
    refb = res_forward_ref(phi1b, actionb, w, b)
    assert outb.shape == (T2, B2, feature_size)
    assert jnp.allclose(outb, refb, atol=1e-3, rtol=1e-3)

    print("KERNEL_OK")
</pallas_src>

<mosaic_0001>
module attributes {stable_mosaic.version = 11 : i64} {
  func.func @res_forward_kernel(%arg0: i32, %arg1: memref<8x32xf32, #tpu.memory_space<vmem>>, %arg2: memref<8x16xf32, #tpu.memory_space<vmem>>, %arg3: memref<10x48x32xf32, #tpu.memory_space<vmem>>, %arg4: memref<10x1x32xf32, #tpu.memory_space<vmem>>, %arg5: memref<8x32xf32, #tpu.memory_space<vmem>>, %arg6: memref<8x48xf32, #tpu.memory_space<vmem>>) attributes {dimension_semantics = [#tpu.dimension_semantics<parallel>], iteration_bounds = array<i64: 1>, scalar_prefetch = 0 : i64, scratch_operands = 1 : i64, tpu.core_type = #tpu.core_type<tc>, window_params = [{transform_indices = @transform_0, window_bounds = array<i64: 8, 32>}, {transform_indices = @transform_1, window_bounds = array<i64: 8, 16>}, {pipeline_mode = #tpu.pipeline_mode<synchronous>, transform_indices = @transform_2, window_bounds = array<i64: 10, 48, 32>}, {pipeline_mode = #tpu.pipeline_mode<synchronous>, transform_indices = @transform_3, window_bounds = array<i64: 10, 1, 32>}, {transform_indices = @transform_4, window_bounds = array<i64: 8, 32>}]} {
    %c0 = arith.constant 0 : index
    %c0_0 = arith.constant 0 : index
    %0 = vector.load %arg2[%c0, %c0_0] : memref<8x16xf32, #tpu.memory_space<vmem>>, vector<8x16xf32>
    %c0_1 = arith.constant 0 : index
    %c32 = arith.constant 32 : index
    %1 = vector.load %arg6[%c0_1, %c32] : memref<8x48xf32, #tpu.memory_space<vmem>>, vector<8x16xf32>
    tpu.vector_store %arg6[%c0_1, %c32], %0 {strides = array<i32>} : memref<8x48xf32, #tpu.memory_space<vmem>>, vector<8x16xf32>,
    %c0_2 = arith.constant 0 : index
    %c0_3 = arith.constant 0 : index
    %2 = vector.load %arg1[%c0_2, %c0_3] : memref<8x32xf32, #tpu.memory_space<vmem>>, vector<8x32xf32>
    %c0_4 = arith.constant 0 : index
    %c0_5 = arith.constant 0 : index
    %3 = vector.load %arg6[%c0_4, %c0_5] : memref<8x48xf32, #tpu.memory_space<vmem>>, vector<8x32xf32>
    tpu.vector_store %arg6[%c0_4, %c0_5], %2 {strides = array<i32>} : memref<8x48xf32, #tpu.memory_space<vmem>>, vector<8x32xf32>,
    %c0_6 = arith.constant 0 : index
    %c0_7 = arith.constant 0 : index
    %4 = vector.load %arg6[%c0_6, %c0_7] : memref<8x48xf32, #tpu.memory_space<vmem>>, vector<8x48xf32>
    %c0_8 = arith.constant 0 : index
    %c0_9 = arith.constant 0 : index
    %c0_10 = arith.constant 0 : index
    %5 = vector.load %arg3[%c0_8, %c0_9, %c0_10] : memref<10x48x32xf32, #tpu.memory_space<vmem>>, vector<1x48x32xf32>
    %6 = vector.shape_cast %5 : vector<1x48x32xf32> to vector<48x32xf32>
    %cst = arith.constant dense<0.000000e+00> : vector<8x32xf32>
    %7 = tpu.matmul %4, %6, %cst {dimension_numbers = #tpu.dot_dimension_numbers<[1], [0], [0], [1], [0, 0, 1, 1], [], []>} : vector<8x48xf32>, vector<48x32xf32>, vector<8x32xf32> -> vector<8x32xf32>
    %c0_11 = arith.constant 0 : index
    %c0_12 = arith.constant 0 : index
    %c0_13 = arith.constant 0 : index
    %8 = vector.load %arg4[%c0_11, %c0_12, %c0_13] : memref<10x1x32xf32, #tpu.memory_space<vmem>>, vector<1x1x32xf32>
    %9 = vector.shape_cast %8 : vector<1x1x32xf32> to vector<1x32xf32>
    %10 = vector.broadcast %9 : vector<1x32xf32> to vector<8x32xf32>
    %11 = arith.addf %7, %10 : vector<8x32xf32>
    %cst_14 = arith.constant 0.000000e+00 : f32
    %12 = vector.broadcast %cst_14 : f32 to vector<8x32xf32>
    %13 = arith.cmpf ogt, %11, %12 : vector<8x32xf32>
    %cst_15 = arith.constant 0.00999999977 : f32
    %14 = vector.broadcast %cst_15 : f32 to vector<8x32xf32>
    %15 = arith.mulf %14, %11 : vector<8x32xf32>
    %16 = arith.select %13, %11, %15 : vector<8x32xi1>, vector<8x32xf32>
    %c0_16 = arith.constant 0 : index
    %c0_17 = arith.constant 0 : index
    %17 = vector.load %arg6[%c0_16, %c0_17] : memref<8x48xf32, #tpu.memory_space<vmem>>, vector<8x32xf32>
    tpu.vector_store %arg6[%c0_16, %c0_17], %16 {strides = array<i32>} : memref<8x48xf32, #tpu.memory_space<vmem>>, vector<8x32xf32>,
    %c0_18 = arith.constant 0 : index
    %c0_19 = arith.constant 0 : index
    %18 = vector.load %arg6[%c0_18, %c0_19] : memref<8x48xf32, #tpu.memory_space<vmem>>, vector<8x48xf32>
    %c1 = arith.constant 1 : index
    %c0_20 = arith.constant 0 : index
    %c0_21 = arith.constant 0 : index
    %19 = vector.load %arg3[%c1, %c0_20, %c0_21] : memref<10x48x32xf32, #tpu.memory_space<vmem>>, vector<1x48x32xf32>
    %20 = vector.shape_cast %19 : vector<1x48x32xf32> to vector<48x32xf32>
    %cst_22 = arith.constant dense<0.000000e+00> : vector<8x32xf32>
    %21 = tpu.matmul %18, %20, %cst_22 {dimension_numbers = #tpu.dot_dimension_numbers<[1], [0], [0], [1], [0, 0, 1, 1], [], []>} : vector<8x48xf32>, vector<48x32xf32>, vector<8x32xf32> -> vector<8x32xf32>
    %c1_23 = arith.constant 1 : index
    %c0_24 = arith.constant 0 : index
    %c0_25 = arith.constant 0 : index
    %22 = vector.load %arg4[%c1_23, %c0_24, %c0_25] : memref<10x1x32xf32, #tpu.memory_space<vmem>>, vector<1x1x32xf32>
    %23 = vector.shape_cast %22 : vector<1x1x32xf32> to vector<1x32xf32>
    %24 = vector.broadcast %23 : vector<1x32xf32> to vector<8x32xf32>
    %25 = arith.addf %21, %24 : vector<8x32xf32>
    %cst_26 = arith.constant 0.000000e+00 : f32
    %26 = vector.broadcast %cst_26 : f32 to vector<8x32xf32>
    %27 = arith.cmpf ogt, %25, %26 : vector<8x32xf32>
    %cst_27 = arith.constant 0.00999999977 : f32
    %28 = vector.broadcast %cst_27 : f32 to vector<8x32xf32>
    %29 = arith.mulf %28, %25 : vector<8x32xf32>
    %30 = arith.select %27, %25, %29 : vector<8x32xi1>, vector<8x32xf32>
    %c0_28 = arith.constant 0 : index
    %c0_29 = arith.constant 0 : index
    %31 = vector.load %arg6[%c0_28, %c0_29] : memref<8x48xf32, #tpu.memory_space<vmem>>, vector<8x32xf32>
    tpu.vector_store %arg6[%c0_28, %c0_29], %30 {strides = array<i32>} : memref<8x48xf32, #tpu.memory_space<vmem>>, vector<8x32xf32>,
    %c0_30 = arith.constant 0 : index
    %c0_31 = arith.constant 0 : index
    %32 = vector.load %arg6[%c0_30, %c0_31] : memref<8x48xf32, #tpu.memory_space<vmem>>, vector<8x48xf32>
    %c2 = arith.constant 2 : index
    %c0_32 = arith.constant 0 : index
    %c0_33 = arith.constant 0 : index
    %33 = vector.load %arg3[%c2, %c0_32, %c0_33] : memref<10x48x32xf32, #tpu.memory_space<vmem>>, vector<1x48x32xf32>
    %34 = vector.shape_cast %33 : vector<1x48x32xf32> to vector<48x32xf32>
    %cst_34 = arith.constant dense<0.000000e+00> : vector<8x32xf32>
    %35 = tpu.matmul %32, %34, %cst_34 {dimension_numbers = #tpu.dot_dimension_numbers<[1], [0], [0], [1], [0, 0, 1, 1], [], []>} : vector<8x48xf32>, vector<48x32xf32>, vector<8x32xf32> -> vector<8x32xf32>
    %c2_35 = arith.constant 2 : index
    %c0_36 = arith.constant 0 : index
    %c0_37 = arith.constant 0 : index
    %36 = vector.load %arg4[%c2_35, %c0_36, %c0_37] : memref<10x1x32xf32, #tpu.memory_space<vmem>>, vector<1x1x32xf32>
    %37 = vector.shape_cast %36 : vector<1x1x32xf32> to vector<1x32xf32>
    %38 = vector.broadcast %37 : vector<1x32xf32> to vector<8x32xf32>
    %39 = arith.addf %35, %38 : vector<8x32xf32>
    %40 = arith.addf %39, %16 : vector<8x32xf32>
    %c0_38 = arith.constant 0 : index
    %c0_39 = arith.constant 0 : index
    %41 = vector.load %arg6[%c0_38, %c0_39] : memref<8x48xf32, #tpu.memory_space<vmem>>, vector<8x32xf32>
    tpu.vector_store %arg6[%c0_38, %c0_39], %40 {strides = array<i32>} : memref<8x48xf32, #tpu.memory_space<vmem>>, vector<8x32xf32>,
    %c0_40 = arith.constant 0 : index
    %c0_41 = arith.constant 0 : index
    %42 = vector.load %arg6[%c0_40, %c0_41] : memref<8x48xf32, #tpu.memory_space<vmem>>, vector<8x48xf32>
    %c3 = arith.constant 3 : index
    %c0_42 = arith.constant 0 : index
    %c0_43 = arith.constant 0 : index
    %43 = vector.load %arg3[%c3, %c0_42, %c0_43] : memref<10x48x32xf32, #tpu.memory_space<vmem>>, vector<1x48x32xf32>
    %44 = vector.shape_cast %43 : vector<1x48x32xf32> to vector<48x32xf32>
    %cst_44 = arith.constant dense<0.000000e+00> : vector<8x32xf32>
    %45 = tpu.matmul %42, %44, %cst_44 {dimension_numbers = #tpu.dot_dimension_numbers<[1], [0], [0], [1], [0, 0, 1, 1], [], []>} : vector<8x48xf32>, vector<48x32xf32>, vector<8x32xf32> -> vector<8x32xf32>
    %c3_45 = arith.constant 3 : index
    %c0_46 = arith.constant 0 : index
    %c0_47 = arith.constant 0 : index
    %46 = vector.load %arg4[%c3_45, %c0_46, %c0_47] : memref<10x1x32xf32, #tpu.memory_space<vmem>>, vector<1x1x32xf32>
    %47 = vector.shape_cast %46 : vector<1x1x32xf32> to vector<1x32xf32>
    %48 = vector.broadcast %47 : vector<1x32xf32> to vector<8x32xf32>
    %49 = arith.addf %45, %48 : vector<8x32xf32>
    %cst_48 = arith.constant 0.000000e+00 : f32
    %50 = vector.broadcast %cst_48 : f32 to vector<8x32xf32>
    %51 = arith.cmpf ogt, %49, %50 : vector<8x32xf32>
    %cst_49 = arith.constant 0.00999999977 : f32
    %52 = vector.broadcast %cst_49 : f32 to vector<8x32xf32>
    %53 = arith.mulf %52, %49 : vector<8x32xf32>
    %54 = arith.select %51, %49, %53 : vector<8x32xi1>, vector<8x32xf32>
    %c0_50 = arith.constant 0 : index
    %c0_51 = arith.constant 0 : index
    %55 = vector.load %arg6[%c0_50, %c0_51] : memref<8x48xf32, #tpu.memory_space<vmem>>, vector<8x32xf32>
    tpu.vector_store %arg6[%c0_50, %c0_51], %54 {strides = array<i32>} : memref<8x48xf32, #tpu.memory_space<vmem>>, vector<8x32xf32>,
    %c0_52 = arith.constant 0 : index
    %c0_53 = arith.constant 0 : index
    %56 = vector.load %arg6[%c0_52, %c0_53] : memref<8x48xf32, #tpu.memory_space<vmem>>, vector<8x48xf32>
    %c4 = arith.constant 4 : index
    %c0_54 = arith.constant 0 : index
    %c0_55 = arith.constant 0 : index
    %57 = vector.load %arg3[%c4, %c0_54, %c0_55] : memref<10x48x32xf32, #tpu.memory_space<vmem>>, vector<1x48x32xf32>
    %58 = vector.shape_cast %57 : vector<1x48x32xf32> to vector<48x32xf32>
    %cst_56 = arith.constant dense<0.000000e+00> : vector<8x32xf32>
    %59 = tpu.matmul %56, %58, %cst_56 {dimension_numbers = #tpu.dot_dimension_numbers<[1], [0], [0], [1], [0, 0, 1, 1], [], []>} : vector<8x48xf32>, vector<48x32xf32>, vector<8x32xf32> -> vector<8x32xf32>
    %c4_57 = arith.constant 4 : index
    %c0_58 = arith.constant 0 : index
    %c0_59 = arith.constant 0 : index
    %60 = vector.load %arg4[%c4_57, %c0_58, %c0_59] : memref<10x1x32xf32, #tpu.memory_space<vmem>>, vector<1x1x32xf32>
    %61 = vector.shape_cast %60 : vector<1x1x32xf32> to vector<1x32xf32>
    %62 = vector.broadcast %61 : vector<1x32xf32> to vector<8x32xf32>
    %63 = arith.addf %59, %62 : vector<8x32xf32>
    %64 = arith.addf %63, %40 : vector<8x32xf32>
    %c0_60 = arith.constant 0 : index
    %c0_61 = arith.constant 0 : index
    %65 = vector.load %arg6[%c0_60, %c0_61] : memref<8x48xf32, #tpu.memory_space<vmem>>, vector<8x32xf32>
    tpu.vector_store %arg6[%c0_60, %c0_61], %64 {strides = array<i32>} : memref<8x48xf32, #tpu.memory_space<vmem>>, vector<8x32xf32>,
    %c0_62 = arith.constant 0 : index
    %c0_63 = arith.constant 0 : index
    %66 = vector.load %arg6[%c0_62, %c0_63] : memref<8x48xf32, #tpu.memory_space<vmem>>, vector<8x48xf32>
    %c5 = arith.constant 5 : index
    %c0_64 = arith.constant 0 : index
    %c0_65 = arith.constant 0 : index
    %67 = vector.load %arg3[%c5, %c0_64, %c0_65] : memref<10x48x32xf32, #tpu.memory_space<vmem>>, vector<1x48x32xf32>
    %68 = vector.shape_cast %67 : vector<1x48x32xf32> to vector<48x32xf32>
    %cst_66 = arith.constant dense<0.000000e+00> : vector<8x32xf32>
    %69 = tpu.matmul %66, %68, %cst_66 {dimension_numbers = #tpu.dot_dimension_numbers<[1], [0], [0], [1], [0, 0, 1, 1], [], []>} : vector<8x48xf32>, vector<48x32xf32>, vector<8x32xf32> -> vector<8x32xf32>
    %c5_67 = arith.constant 5 : index
    %c0_68 = arith.constant 0 : index
    %c0_69 = arith.constant 0 : index
    %70 = vector.load %arg4[%c5_67, %c0_68, %c0_69] : memref<10x1x32xf32, #tpu.memory_space<vmem>>, vector<1x1x32xf32>
    %71 = vector.shape_cast %70 : vector<1x1x32xf32> to vector<1x32xf32>
    %72 = vector.broadcast %71 : vector<1x32xf32> to vector<8x32xf32>
    %73 = arith.addf %69, %72 : vector<8x32xf32>
    %cst_70 = arith.constant 0.000000e+00 : f32
    %74 = vector.broadcast %cst_70 : f32 to vector<8x32xf32>
    %75 = arith.cmpf ogt, %73, %74 : vector<8x32xf32>
    %cst_71 = arith.constant 0.00999999977 : f32
    %76 = vector.broadcast %cst_71 : f32 to vector<8x32xf32>
    %77 = arith.mulf %76, %73 : vector<8x32xf32>
    %78 = arith.select %75, %73, %77 : vector<8x32xi1>, vector<8x32xf32>
    %c0_72 = arith.constant 0 : index
    %c0_73 = arith.constant 0 : index
    %79 = vector.load %arg6[%c0_72, %c0_73] : memref<8x48xf32, #tpu.memory_space<vmem>>, vector<8x32xf32>
    tpu.vector_store %arg6[%c0_72, %c0_73], %78 {strides = array<i32>} : memref<8x48xf32, #tpu.memory_space<vmem>>, vector<8x32xf32>,
    %c0_74 = arith.constant 0 : index
    %c0_75 = arith.constant 0 : index
    %80 = vector.load %arg6[%c0_74, %c0_75] : memref<8x48xf32, #tpu.memory_space<vmem>>, vector<8x48xf32>
    %c6 = arith.constant 6 : index
    %c0_76 = arith.constant 0 : index
    %c0_77 = arith.constant 0 : index
    %81 = vector.load %arg3[%c6, %c0_76, %c0_77] : memref<10x48x32xf32, #tpu.memory_space<vmem>>, vector<1x48x32xf32>
    %82 = vector.shape_cast %81 : vector<1x48x32xf32> to vector<48x32xf32>
    %cst_78 = arith.constant dense<0.000000e+00> : vector<8x32xf32>
    %83 = tpu.matmul %80, %82, %cst_78 {dimension_numbers = #tpu.dot_dimension_numbers<[1], [0], [0], [1], [0, 0, 1, 1], [], []>} : vector<8x48xf32>, vector<48x32xf32>, vector<8x32xf32> -> vector<8x32xf32>
    %c6_79 = arith.constant 6 : index
    %c0_80 = arith.constant 0 : index
    %c0_81 = arith.constant 0 : index
    %84 = vector.load %arg4[%c6_79, %c0_80, %c0_81] : memref<10x1x32xf32, #tpu.memory_space<vmem>>, vector<1x1x32xf32>
    %85 = vector.shape_cast %84 : vector<1x1x32xf32> to vector<1x32xf32>
    %86 = vector.broadcast %85 : vector<1x32xf32> to vector<8x32xf32>
    %87 = arith.addf %83, %86 : vector<8x32xf32>
    %88 = arith.addf %87, %64 : vector<8x32xf32>
    %c0_82 = arith.constant 0 : index
    %c0_83 = arith.constant 0 : index
    %89 = vector.load %arg6[%c0_82, %c0_83] : memref<8x48xf32, #tpu.memory_space<vmem>>, vector<8x32xf32>
    tpu.vector_store %arg6[%c0_82, %c0_83], %88 {strides = array<i32>} : memref<8x48xf32, #tpu.memory_space<vmem>>, vector<8x32xf32>,
    %c0_84 = arith.constant 0 : index
    %c0_85 = arith.constant 0 : index
    %90 = vector.load %arg6[%c0_84, %c0_85] : memref<8x48xf32, #tpu.memory_space<vmem>>, vector<8x48xf32>
    %c7 = arith.constant 7 : index
    %c0_86 = arith.constant 0 : index
    %c0_87 = arith.constant 0 : index
    %91 = vector.load %arg3[%c7, %c0_86, %c0_87] : memref<10x48x32xf32, #tpu.memory_space<vmem>>, vector<1x48x32xf32>
    %92 = vector.shape_cast %91 : vector<1x48x32xf32> to vector<48x32xf32>
    %cst_88 = arith.constant dense<0.000000e+00> : vector<8x32xf32>
    %93 = tpu.matmul %90, %92, %cst_88 {dimension_numbers = #tpu.dot_dimension_numbers<[1], [0], [0], [1], [0, 0, 1, 1], [], []>} : vector<8x48xf32>, vector<48x32xf32>, vector<8x32xf32> -> vector<8x32xf32>
    %c7_89 = arith.constant 7 : index
    %c0_90 = arith.constant 0 : index
    %c0_91 = arith.constant 0 : index
    %94 = vector.load %arg4[%c7_89, %c0_90, %c0_91] : memref<10x1x32xf32, #tpu.memory_space<vmem>>, vector<1x1x32xf32>
    %95 = vector.shape_cast %94 : vector<1x1x32xf32> to vector<1x32xf32>
    %96 = vector.broadcast %95 : vector<1x32xf32> to vector<8x32xf32>
    %97 = arith.addf %93, %96 : vector<8x32xf32>
    %cst_92 = arith.constant 0.000000e+00 : f32
    %98 = vector.broadcast %cst_92 : f32 to vector<8x32xf32>
    %99 = arith.cmpf ogt, %97, %98 : vector<8x32xf32>
    %cst_93 = arith.constant 0.00999999977 : f32
    %100 = vector.broadcast %cst_93 : f32 to vector<8x32xf32>
    %101 = arith.mulf %100, %97 : vector<8x32xf32>
    %102 = arith.select %99, %97, %101 : vector<8x32xi1>, vector<8x32xf32>
    %c0_94 = arith.constant 0 : index
    %c0_95 = arith.constant 0 : index
    %103 = vector.load %arg6[%c0_94, %c0_95] : memref<8x48xf32, #tpu.memory_space<vmem>>, vector<8x32xf32>
    tpu.vector_store %arg6[%c0_94, %c0_95], %102 {strides = array<i32>} : memref<8x48xf32, #tpu.memory_space<vmem>>, vector<8x32xf32>,
    %c0_96 = arith.constant 0 : index
    %c0_97 = arith.constant 0 : index
    %104 = vector.load %arg6[%c0_96, %c0_97] : memref<8x48xf32, #tpu.memory_space<vmem>>, vector<8x48xf32>
    %c8 = arith.constant 8 : index
    %c0_98 = arith.constant 0 : index
    %c0_99 = arith.constant 0 : index
    %105 = vector.load %arg3[%c8, %c0_98, %c0_99] : memref<10x48x32xf32, #tpu.memory_space<vmem>>, vector<1x48x32xf32>
    %106 = vector.shape_cast %105 : vector<1x48x32xf32> to vector<48x32xf32>
    %cst_100 = arith.constant dense<0.000000e+00> : vector<8x32xf32>
    %107 = tpu.matmul %104, %106, %cst_100 {dimension_numbers = #tpu.dot_dimension_numbers<[1], [0], [0], [1], [0, 0, 1, 1], [], []>} : vector<8x48xf32>, vector<48x32xf32>, vector<8x32xf32> -> vector<8x32xf32>
    %c8_101 = arith.constant 8 : index
    %c0_102 = arith.constant 0 : index
    %c0_103 = arith.constant 0 : index
    %108 = vector.load %arg4[%c8_101, %c0_102, %c0_103] : memref<10x1x32xf32, #tpu.memory_space<vmem>>, vector<1x1x32xf32>
    %109 = vector.shape_cast %108 : vector<1x1x32xf32> to vector<1x32xf32>
    %110 = vector.broadcast %109 : vector<1x32xf32> to vector<8x32xf32>
    %111 = arith.addf %107, %110 : vector<8x32xf32>
    %112 = arith.addf %111, %88 : vector<8x32xf32>
    %c0_104 = arith.constant 0 : index
    %c0_105 = arith.constant 0 : index
    %113 = vector.load %arg6[%c0_104, %c0_105] : memref<8x48xf32, #tpu.memory_space<vmem>>, vector<8x32xf32>
    tpu.vector_store %arg6[%c0_104, %c0_105], %112 {strides = array<i32>} : memref<8x48xf32, #tpu.memory_space<vmem>>, vector<8x32xf32>,
    %c0_106 = arith.constant 0 : index
    %c0_107 = arith.constant 0 : index
    %114 = vector.load %arg6[%c0_106, %c0_107] : memref<8x48xf32, #tpu.memory_space<vmem>>, vector<8x48xf32>
    %c9 = arith.constant 9 : index
    %c0_108 = arith.constant 0 : index
    %c0_109 = arith.constant 0 : index
    %115 = vector.load %arg3[%c9, %c0_108, %c0_109] : memref<10x48x32xf32, #tpu.memory_space<vmem>>, vector<1x48x32xf32>
    %116 = vector.shape_cast %115 : vector<1x48x32xf32> to vector<48x32xf32>
    %cst_110 = arith.constant dense<0.000000e+00> : vector<8x32xf32>
    %117 = tpu.matmul %114, %116, %cst_110 {dimension_numbers = #tpu.dot_dimension_numbers<[1], [0], [0], [1], [0, 0, 1, 1], [], []>} : vector<8x48xf32>, vector<48x32xf32>, vector<8x32xf32> -> vector<8x32xf32>
    %c9_111 = arith.constant 9 : index
    %c0_112 = arith.constant 0 : index
    %c0_113 = arith.constant 0 : index
    %118 = vector.load %arg4[%c9_111, %c0_112, %c0_113] : memref<10x1x32xf32, #tpu.memory_space<vmem>>, vector<1x1x32xf32>
    %119 = vector.shape_cast %118 : vector<1x1x32xf32> to vector<1x32xf32>
    %120 = vector.broadcast %119 : vector<1x32xf32> to vector<8x32xf32>
    %121 = arith.addf %117, %120 : vector<8x32xf32>
    %c0_114 = arith.constant 0 : index
    %c0_115 = arith.constant 0 : index
    %122 = vector.load %arg5[%c0_114, %c0_115] : memref<8x32xf32, #tpu.memory_space<vmem>>, vector<8x32xf32>
    tpu.vector_store %arg5[%c0_114, %c0_115], %121 {strides = array<i32>} : memref<8x32xf32, #tpu.memory_space<vmem>>, vector<8x32xf32>,
    return
  }
  func.func @transform_0(%arg0: i32) -> (i32, i32) {
    %c0_i32 = arith.constant 0 : i32
    %c0_i32_0 = arith.constant 0 : i32
    return %arg0, %c0_i32 : i32, i32
  }
  func.func @transform_1(%arg0: i32) -> (i32, i32) {
    %c0_i32 = arith.constant 0 : i32
    %c0_i32_0 = arith.constant 0 : i32
    return %arg0, %c0_i32 : i32, i32
  }
  func.func @transform_2(%arg0: i32) -> (i32, i32, i32) {
    %c0_i32 = arith.constant 0 : i32
    %c0_i32_0 = arith.constant 0 : i32
    %c0_i32_1 = arith.constant 0 : i32
    %c0_i32_2 = arith.constant 0 : i32
    return %c0_i32, %c0_i32_0, %c0_i32_1 : i32, i32, i32
  }
  func.func @transform_3(%arg0: i32) -> (i32, i32, i32) {
    %c0_i32 = arith.constant 0 : i32
    %c0_i32_0 = arith.constant 0 : i32
    %c0_i32_1 = arith.constant 0 : i32
    %c0_i32_2 = arith.constant 0 : i32
    return %c0_i32, %c0_i32_0, %c0_i32_1 : i32, i32, i32
  }
  func.func @transform_4(%arg0: i32) -> (i32, i32) {
    %c0_i32 = arith.constant 0 : i32
    %c0_i32_0 = arith.constant 0 : i32
    return %arg0, %c0_i32 : i32, i32
  }
}

</mosaic_0001>

<bundles_post_ra>
// kernel: res_forward.1
= control target key start
LH: loop header
LB: loop body
LE: loop exit
PB: predicated region body
PF: predicated region fallthrough
CT: control target
= control target key end

     0   :  { %s543_s19 = smov 32   ;;  %s810_s0 = inlined_call_operand.vmem [shape: f32[8,32], index: 0, kind: input, shape index: {}]   ;;  %s811_s1 = inlined_call_operand.vmem [shape: f32[8,16], index: 1, kind: input, shape index: {}]   ;;  %s812_s2 = inlined_call_operand.vmem [shape: f32[10,48,32], index: 2, kind: input, shape index: {}]   ;;  %s813_s3 = inlined_call_operand.vmem [shape: f32[10,1,32], index: 3, kind: input, shape index: {}]   ;;  %s814_s4 = inlined_call_operand.hbm [shape: f32[8,32], index: 4, kind: output, shape index: {}]  }
   0x1   :  { %v18_v0 = vld [vmem:[%s811_s1] sm:$0xff]  ;;  %v34_v1 = vld [vmem:[%s812_s2 + $0x28] sm:$0xff] }
   0x2   :  { %20 = vrot.lane.b32.xlu0 %v18_v0, %s543_s19  ;;  %53 = vmatpush.msra.mxu0 %v34_v1 }
   0x3   :  { %9 = vsyncpa [#allocation4], 0  ;;  %v33_v2 = vld [vmem:[%s812_s2 + $0x20] sm:$0xff]  ;;  %v32_v3 = vld [vmem:[%s812_s2 + $0x18] sm:$0xff]  ;;  %vm23_vm0 = vcmask 392448   ;;  %vm26_vm1 = vcmask 261120  }
   0x4   :  { %54 = vmatpush.msra.mxu0 %v33_v2  ;;  %v31_v4 = vld [vmem:[%s812_s2 + $0x10] sm:$0xff]  ;;  %v30_v5 = vld [vmem:[%s812_s2 + $0x8] sm:$0xff]  ;;  %v29_v6 = vld [vmem:[%s812_s2] sm:$0xff]  ;;  %vm39_vm2 = vcmask 392192   ;;  %s544_s20 = smov [#allocation3]   ;;  %s423_s23 = sshll.u32 %s814_s4, 4  ;;  %s424_s23 = int_to_ptr.hbm [resolvable:$true] %s423_s23 }
   0x5   :  { %v25_v7 = vld [vmem:[%s810_s0] sm:$0xff]  ;;  %v438_v10 = vld [vmem:[%s812_s2 + $0x58] sm:$0xff]  ;;  %v437_v11 = vld [vmem:[%s812_s2 + $0x50] sm:$0xff] }
   0x6   :  { %55 = vmatpush.msra.mxu0 %v32_v3  ;;  %93 = vmatpush.msra.mxu1 %v438_v10  ;;  %v436_v12 = vld [vmem:[%s812_s2 + $0x48] sm:$0xff]  ;;  %v435_v13 = vld [vmem:[%s812_s2 + $0x40] sm:$0xff]  ;;  %v434_v14 = vld [vmem:[%s812_s2 + $0x38] sm:$0xff] }
   0x7   :  { %v433_v15 = vld [vmem:[%s812_s2 + $0x30] sm:$0xff]  ;;  %v507_v16 = vld [vmem:[%s813_s3] ss:$0 sm:$0xff]  ;;  %v446_v22 = vld [vmem:[%s812_s2 + $0x88] sm:$0xff] }
   0x8   :  { %56 = vmatpush.msra.mxu0 %v31_v4  ;;  %94 = vmatpush.msra.mxu1 %v437_v11  ;;  %v445_v23 = vld [vmem:[%s812_s2 + $0x80] sm:$0xff]  ;;  %v444_v24 = vld [vmem:[%s812_s2 + $0x78] sm:$0xff]  ;;  %v443_v25 = vld [vmem:[%s812_s2 + $0x70] sm:$0xff] }
   0x9   :  { %133 = vmatpush.msra.mxu2 %v446_v22  ;;  %v442_v26 = vld [vmem:[%s812_s2 + $0x68] sm:$0xff]  ;;  %v441_v27 = vld [vmem:[%s812_s2 + $0x60] sm:$0xff]  ;;  %v454_v34 = vld [vmem:[%s812_s2 + $0xb8] sm:$0xff] }
   0xa   :  { %57 = vmatpush.msra.mxu0 %v30_v5  ;;  %95 = vmatpush.msra.mxu1 %v436_v12  ;;  %v508_v28 = vld [vmem:[%s813_s3 + $0x1] ss:$0 sm:$0xff]  ;;  %v453_v35 = vld [vmem:[%s812_s2 + $0xb0] sm:$0xff]  ;;  %v452_v36 = vld [vmem:[%s812_s2 + $0xa8] sm:$0xff] }
   0xb   :  { %134 = vmatpush.msra.mxu2 %v445_v23  ;;  %171 = vmatpush.msra.mxu3 %v454_v34  ;;  %v451_v37 = vld [vmem:[%s812_s2 + $0xa0] sm:$0xff]  ;;  %v450_v38 = vld [vmem:[%s812_s2 + $0x98] sm:$0xff]  ;;  %v449_v39 = vld [vmem:[%s812_s2 + $0x90] sm:$0xff] }
   0xc   :  { %58 = vmatpush.msra.mxu0 %v29_v6  ;;  %96 = vmatpush.msra.mxu1 %v435_v13  ;;  %v509_v40 = vld [vmem:[%s813_s3 + $0x2] ss:$0 sm:$0xff]  ;;  %v462_v45 = vld [vmem:[%s812_s2 + $0xe8] sm:$0xff]  ;;  %v460_v47 = vld [vmem:[%s812_s2 + $0xd8] sm:$0xff] }
   0xd   :  { %135 = vmatpush.msra.mxu2 %v444_v24  ;;  %172 = vmatpush.msra.mxu3 %v453_v35  ;;  %v461_v46 = vld [vmem:[%s812_s2 + $0xe0] sm:$0xff]  ;;  %v459_v48 = vld [vmem:[%s812_s2 + $0xd0] sm:$0xff]  ;;  %v458_v49 = vld [vmem:[%s812_s2 + $0xc8] sm:$0xff] }
   0xe   :  { %97 = vmatpush.msra.mxu1 %v434_v14  ;;  %211 = vmatpush.msrb.mxu0 %v462_v45  ;;  %v457_v50 = vld [vmem:[%s812_s2 + $0xc0] sm:$0xff]  ;;  %v470_v57 = vld [vmem:[%s812_s2 + $0x118] sm:$0xff]  ;;  %v469_v58 = vld [vmem:[%s812_s2 + $0x110] sm:$0xff] }
   0xf   :  { %136 = vmatpush.msra.mxu2 %v443_v25  ;;  %173 = vmatpush.msra.mxu3 %v452_v36  ;;  %v510_v51 = vld [vmem:[%s813_s3 + $0x3] ss:$0 sm:$0xff]  ;;  %v468_v59 = vld [vmem:[%s812_s2 + $0x108] sm:$0xff]  ;;  %v466_v61 = vld [vmem:[%s812_s2 + $0xf8] sm:$0xff] }
  0x10   :  { %98 = vmatpush.msra.mxu1 %v433_v15  ;;  %212 = vmatpush.msrb.mxu0 %v461_v46  ;;  %v467_v60 = vld [vmem:[%s812_s2 + $0x100] sm:$0xff]  ;;  %v465_v62 = vld [vmem:[%s812_s2 + $0xf0] sm:$0xff]  ;;  %v478_v4 = vld [vmem:[%s812_s2 + $0x148] sm:$0xff] }
  0x11   :  { %137 = vmatpush.msra.mxu2 %v442_v26  ;;  %174 = vmatpush.msra.mxu3 %v451_v37  ;;  %v511_v63 = vld [vmem:[%s813_s3 + $0x4] ss:$0 sm:$0xff]  ;;  %v476_v6 = vld [vmem:[%s812_s2 + $0x138] sm:$0xff]  ;;  %v512_v10 = vld [vmem:[%s813_s3 + $0x5] ss:$0 sm:$0xff] }
  0x12   :  { %213 = vmatpush.msrb.mxu0 %v460_v47  ;;  %249 = vmatpush.msrb.mxu1 %v470_v57  ;;  %v477_v5 = vld [vmem:[%s812_s2 + $0x140] sm:$0xff]  ;;  %v515_v45 = vld [vmem:[%s813_s3 + $0x8] ss:$0 sm:$0xff] }
  0x13   :  { %138 = vmatpush.msra.mxu2 %v441_v27  ;;  %175 = vmatpush.msra.mxu3 %v450_v38  ;;  %v513_v22 = vld [vmem:[%s813_s3 + $0x6] ss:$0 sm:$0xff]  ;;  %v494_v27 = vld [vmem:[%s812_s2 + $0x1a8] sm:$0xff] }
  0x14   :  { %214 = vmatpush.msrb.mxu0 %v459_v48  ;;  %250 = vmatpush.msrb.mxu1 %v469_v58 }
  0x15   :  { %176 = vmatpush.msra.mxu3 %v449_v39  ;;  %289 = vmatpush.msrb.mxu2 %v478_v4  ;;  %v502_v39 = vld [vmem:[%s812_s2 + $0x1d8] sm:$0xff] }
  0x16   :  { %215 = vmatpush.msrb.mxu0 %v458_v49  ;;  %251 = vmatpush.msrb.mxu1 %v468_v59 }
  0x17   :  { %290 = vmatpush.msrb.mxu2 %v477_v5 }
  0x18   :  { %216 = vmatpush.msrb.mxu0 %v457_v50  ;;  %252 = vmatpush.msrb.mxu1 %v467_v60  ;;  %v516_v50 = vld [vmem:[%s813_s3 + $0x9] ss:$0 sm:$0xff] }
  0x19   :  { %291 = vmatpush.msrb.mxu2 %v476_v6 }
  0x1a   :  { %253 = vmatpush.msrb.mxu1 %v466_v61 }
  0x1c   :  { %254 = vmatpush.msrb.mxu1 %v465_v62 }
  0x74   :  { %v21_v8 = vpop.permute.xlu0 %20 }
  0x75   :  { %24 = vst.msk [vmem:[#allocation2] sm:$0xff] %vm23_vm0, %v21_v8  ;;  %v474_v8 = vld [vmem:[%s812_s2 + $0x128] sm:$0xff] }
  0x76   :  { %27 = vst.msk [vmem:[#allocation2] sm:$0xff] %vm26_vm1, %v25_v7  ;;  %v475_v7 = vld [vmem:[%s812_s2 + $0x130] sm:$0xff] }
  0x77   :  { %292 = vmatpush.msrb.mxu2 %v475_v7 }
  0x79   :  { %293 = vmatpush.msrb.mxu2 %v474_v8 }
  0x7d   :  { %v28_v9 = vld [vmem:[#allocation2] sm:$0xff] }
  0x7e   :  { %432 = vmatmul.msk.f32.vlgmr.msra.gmra.mxu0 %vm39_vm2, %v28_v9  ;;  %v473_v9 = vld [vmem:[%s812_s2 + $0x120] sm:$0xff] }
  0x7f   :  { %294 = vmatpush.msrb.mxu2 %v473_v9  ;;  %367 = vmatpush.msra.mxu0 %v494_v27 }
  0xfb   :  { %v60_v17 = vpop.f32.mrf.mxu0 }
  0xfc   :  { %v61_v18 = vadd.f32 %v507_v16, %v60_v17  ;;  %v486_v16 = vld [vmem:[%s812_s2 + $0x178] sm:$0xff]  ;;  %v485_v17 = vld [vmem:[%s812_s2 + $0x170] sm:$0xff] }
  0xfd   :  { %327 = vmatpush.msrb.mxu3 %v486_v16 }
  0xfe   :  { %vm63_vm3 = vcmp.gt.f32.partialorder %v61_v18, 0.0  ;;  %v64_v19 = vmul.f32 0.01, %v61_v18 }
  0xff   :  { %328 = vmatpush.msrb.mxu3 %v485_v17 }
 0x100   :  { %v65_v20 = vsel %vm63_vm3, %v61_v18, %v64_v19  ;;  %v484_v18 = vld [vmem:[%s812_s2 + $0x168] sm:$0xff]  ;;  %v483_v19 = vld [vmem:[%s812_s2 + $0x160] sm:$0xff] }
 0x101   :  { %66 = vst.msk [vmem:[#allocation2] sm:$0xff] %vm26_vm1, %v65_v20  ;;  %329 = vmatpush.msrb.mxu3 %v484_v18 }
 0x103   :  { %330 = vmatpush.msrb.mxu3 %v483_v19 }
 0x108   :  { %v67_v21 = vld [vmem:[#allocation2] sm:$0xff] }
 0x109   :  { %440 = vmatmul.msk.f32.vlgmr.msra.gmra.mxu1 %vm39_vm2, %v67_v21  ;;  %v481_v21 = vld [vmem:[%s812_s2 + $0x150] sm:$0xff] }
 0x10a   :  { %405 = vmatpush.msra.mxu1 %v502_v39 }
 0x186   :  { %v100_v29 = vpop.f32.mrf.mxu1 }
 0x187   :  { %v101_v30 = vadd.f32 %v508_v28, %v100_v29  ;;  %v493_v28 = vld [vmem:[%s812_s2 + $0x1a0] sm:$0xff]  ;;  %v492_v29 = vld [vmem:[%s812_s2 + $0x198] sm:$0xff] }
 0x188   :  { %368 = vmatpush.msra.mxu0 %v493_v28 }
 0x189   :  { %vm103_vm4 = vcmp.gt.f32.partialorder %v101_v30, 0.0  ;;  %v104_v31 = vmul.f32 0.01, %v101_v30 }
 0x18a   :  { %369 = vmatpush.msra.mxu0 %v492_v29 }
 0x18b   :  { %v105_v32 = vsel %vm103_vm4, %v101_v30, %v104_v31  ;;  %v491_v30 = vld [vmem:[%s812_s2 + $0x190] sm:$0xff]  ;;  %v490_v31 = vld [vmem:[%s812_s2 + $0x188] sm:$0xff] }
 0x18c   :  { %106 = vst.msk [vmem:[#allocation2] sm:$0xff] %vm26_vm1, %v105_v32  ;;  %370 = vmatpush.msra.mxu0 %v491_v30  ;;  %v489_v32 = vld [vmem:[%s812_s2 + $0x180] sm:$0xff] }
 0x18e   :  { %371 = vmatpush.msra.mxu0 %v490_v31 }
 0x190   :  { %372 = vmatpush.msra.mxu0 %v489_v32 }
 0x193   :  { %v107_v33 = vld [vmem:[#allocation2] sm:$0xff] }
 0x194   :  { %448 = vmatmul.msk.f32.vlgmr.msra.gmra.mxu2 %vm39_vm2, %v107_v33  ;;  %v514_v33 = vld [vmem:[%s813_s3 + $0x7] ss:$0 sm:$0xff] }
 0x217   :  { %v140_v41 = vpop.f32.mrf.mxu2 }
 0x218   :  { %v141_v42 = vadd.f32 %v509_v40, %v140_v41  ;;  %v501_v40 = vld [vmem:[%s812_s2 + $0x1d0] sm:$0xff]  ;;  %v500_v41 = vld [vmem:[%s812_s2 + $0x1c8] sm:$0xff] }
 0x219   :  { %406 = vmatpush.msra.mxu1 %v501_v40 }
 0x21a   :  { %v143_v43 = vadd.f32 %v141_v42, %v65_v20  ;;  %v482_v20 = vld [vmem:[%s812_s2 + $0x158] sm:$0xff]  ;;  %v499_v42 = vld [vmem:[%s812_s2 + $0x1c0] sm:$0xff] }
 0x21b   :  { %331 = vmatpush.msrb.mxu3 %v482_v20  ;;  %407 = vmatpush.msra.mxu1 %v500_v41 }
 0x21c   :  { %144 = vst.msk [vmem:[#allocation2] sm:$0xff] %vm26_vm1, %v143_v43 }
 0x21d   :  { %332 = vmatpush.msrb.mxu3 %v481_v21  ;;  %408 = vmatpush.msra.mxu1 %v499_v42 }
 0x223   :  { %v145_v44 = vld [vmem:[#allocation2] sm:$0xff] }
 0x224   :  { %456 = vmatmul.msk.f32.vlgmr.msra.gmra.mxu3 %vm39_vm2, %v145_v44  ;;  %v497_v44 = vld [vmem:[%s812_s2 + $0x1b0] sm:$0xff] }
 0x2a7   :  { %v178_v52 = vpop.f32.mrf.mxu3 }
 0x2a8   :  { %v179_v53 = vadd.f32 %v510_v51, %v178_v52 }
 0x2aa   :  { %vm181_vm5 = vcmp.gt.f32.partialorder %v179_v53, 0.0  ;;  %v182_v54 = vmul.f32 0.01, %v179_v53 }
 0x2ac   :  { %v183_v55 = vsel %vm181_vm5, %v179_v53, %v182_v54 }
 0x2ad   :  { %184 = vst.msk [vmem:[#allocation2] sm:$0xff] %vm26_vm1, %v183_v55 }
 0x2b4   :  { %v185_v56 = vld [vmem:[#allocation2] sm:$0xff] }
 0x2b5   :  { %464 = vmatmul.msk.f32.vlgmr.msrb.gmra.mxu0 %vm39_vm2, %v185_v56 }
 0x332   :  { %v218_v0 = vpop.f32.mrf.mxu0 }
 0x333   :  { %v219_v1 = vadd.f32 %v511_v63, %v218_v0 }
 0x335   :  { %v221_v2 = vadd.f32 %v219_v1, %v143_v43  ;;  %v498_v43 = vld [vmem:[%s812_s2 + $0x1b8] sm:$0xff]  ;;  %s421_s2 = sshll.u32 %s544_s20, 4  ;;  %s422_s2 = int_to_ptr.vmem [resolvable:$true] %s421_s2 }
 0x336   :  { %409 = vmatpush.msra.mxu1 %v498_v43 }
 0x337   :  { %222 = vst.msk [vmem:[#allocation2] sm:$0xff] %vm26_vm1, %v221_v2 }
 0x338   :  { %410 = vmatpush.msra.mxu1 %v497_v44 }
 0x33e   :  { %v223_v3 = vld [vmem:[#allocation2] sm:$0xff] }
 0x33f   :  { %472 = vmatmul.msk.f32.vlgmr.msrb.gmra.mxu1 %vm39_vm2, %v223_v3 }
 0x3bc   :  { %v256_v11 = vpop.f32.mrf.mxu1 }
 0x3bd   :  { %v257_v12 = vadd.f32 %v512_v10, %v256_v11 }
 0x3bf   :  { %vm259_vm6 = vcmp.gt.f32.partialorder %v257_v12, 0.0  ;;  %v260_v13 = vmul.f32 0.01, %v257_v12 }
 0x3c1   :  { %v261_v14 = vsel %vm259_vm6, %v257_v12, %v260_v13 }
 0x3c2   :  { %262 = vst.msk [vmem:[#allocation2] sm:$0xff] %vm26_vm1, %v261_v14 }
 0x3c9   :  { %v263_v15 = vld [vmem:[#allocation2] sm:$0xff] }
 0x3ca   :  { %480 = vmatmul.msk.f32.vlgmr.msrb.gmra.mxu2 %vm39_vm2, %v263_v15 }
 0x44d   :  { %v296_v23 = vpop.f32.mrf.mxu2 }
 0x44e   :  { %v297_v24 = vadd.f32 %v513_v22, %v296_v23 }
 0x450   :  { %v299_v25 = vadd.f32 %v297_v24, %v221_v2 }
 0x452   :  { %300 = vst.msk [vmem:[#allocation2] sm:$0xff] %vm26_vm1, %v299_v25 }
 0x459   :  { %v301_v26 = vld [vmem:[#allocation2] sm:$0xff] }
 0x45a   :  { %488 = vmatmul.msk.f32.vlgmr.msrb.gmra.mxu3 %vm39_vm2, %v301_v26 }
 0x4dd   :  { %v334_v34 = vpop.f32.mrf.mxu3 }
 0x4de   :  { %v335_v35 = vadd.f32 %v514_v33, %v334_v34 }
 0x4e0   :  { %vm337_vm7 = vcmp.gt.f32.partialorder %v335_v35, 0.0  ;;  %v338_v36 = vmul.f32 0.01, %v335_v35 }
 0x4e2   :  { %v339_v37 = vsel %vm337_vm7, %v335_v35, %v338_v36 }
 0x4e3   :  { %340 = vst.msk [vmem:[#allocation2] sm:$0xff] %vm26_vm1, %v339_v37 }
 0x4ea   :  { %v341_v38 = vld [vmem:[#allocation2] sm:$0xff] }
 0x4eb   :  { %496 = vmatmul.msk.f32.vlgmr.msra.gmra.mxu0 %vm39_vm2, %v341_v38 }
 0x568   :  { %v374_v46 = vpop.f32.mrf.mxu0 }
 0x569   :  { %v375_v47 = vadd.f32 %v515_v45, %v374_v46 }
 0x56b   :  { %v377_v48 = vadd.f32 %v375_v47, %v299_v25 }
 0x56d   :  { %378 = vst.msk [vmem:[#allocation2] sm:$0xff] %vm26_vm1, %v377_v48 }
 0x574   :  { %v379_v49 = vld [vmem:[#allocation2] sm:$0xff] }
 0x575   :  { %504 = vmatmul.msk.f32.vlgmr.msra.gmra.mxu1 %vm39_vm2, %v379_v49 }
 0x5f2   :  { %v412_v51 = vpop.f32.mrf.mxu1 }
 0x5f3   :  { %v413_v52 = vadd.f32 %v516_v50, %v412_v51 }
 0x5f5   :  { %415 = vst.msk [vmem:[#allocation3] sm:$0xff] %vm26_vm1, %v413_v52 }
 0x5f6   :  { %426 = dma.vmem_to_hbm [thread:$0]  %s422_s2, 128, %s424_s23, [#allocation4]  }
 0x5f7   :  { %541 = dma.done.wait [#allocation4], 128  }
 0x5f8   :  { %542 = vsyncadd [#allocation4], 4294967168 }
 0x5f9   :  { %431 = vsyncpa [#allocation4], 1 }

</bundles_post_ra>
